<compile_context>
chip_gen: v7x
topology: tpu7x:2x2x1
jax: 0.10.0
libtpu: 0.0.40
codegen_flags: <defaults>
</compile_context>

<pallas_src>
from functools import partial

import jax
import jax.numpy as jnp
from jax.experimental import pallas as pl
from jax.experimental.pallas import tpu as pltpu

_LANE = 128
_SUBLANE = 8


def _round_up(x, m):
    return (x + m - 1) // m * m


def _vmem_budget():
    """Per-generation scoped-VMEM limit and tile-sizing budget (bytes)."""
    try:
        cap = int(pltpu.get_tpu_info().vmem_capacity_bytes)
    except Exception:
        cap = 64 << 20  # conservative (v7x-sized) default if query unavailable
    # 128 MiB chips (v5e/v6e) -> 96 MiB limit; 64 MiB chips (v7x) -> 48 MiB.
    limit = max(32 << 20, min(96 << 20, (cap * 3) // 4))
    budget = (limit * 3) // 4  # headroom for compiler scratch / small buffers
    return limit, budget


# --------------------------------------------------------------------------
# Single-pass kernel: whole batch of one lane-dense feature tile in VMEM.
# --------------------------------------------------------------------------
def _bn_single_pass_kernel(x_ref, params_ref, o_ref, stats_ref, *, eps, momentum):
    """x_ref: (N, tf).  params_ref: (4, tf) = [weight; bias; run_mean; run_var].
    Outputs: o_ref (N, tf), stats_ref (2, tf) = [new_run_mean; new_run_var]."""
    x = x_ref[...].astype(jnp.float32)                  # (N, tf)
    mean = jnp.mean(x, axis=0, keepdims=True)           # (1, tf)
    xc = x - mean                                       # reused for var and out
    var = jnp.mean(xc * xc, axis=0, keepdims=True)      # biased (unbiased=False)
    dev = jnp.sqrt(var)                                 # std

    p = params_ref[...].astype(jnp.float32)             # (4, tf)
    w = p[0:1, :]
    b = p[1:2, :]
    rm_rv = p[2:4, :]                                   # (2, tf)

    # Exact division, once per feature row (HBM-bound kernel -> free).
    scale = w / (dev + eps)                             # (1, tf)
    o_ref[...] = (xc * scale + b).astype(o_ref.dtype)

    # Fused EMA running-stat update (for 'SD' the module tracks std in
    # running_var, exactly like the PyTorch code).
    md = jnp.concatenate([mean, dev], axis=0)           # (2, tf)
    stats_ref[...] = momentum * md + (1.0 - momentum) * rm_rv


# --------------------------------------------------------------------------
# Two-pass (N-tiled) fallback for large N.
# --------------------------------------------------------------------------
def _bn_stats_kernel(x_ref, stats_ref, sum_ref, sq_ref, *,
                     n_total, tile_n, mask_rows):
    """Pass 1: accumulate sum / sum-of-squares over the N axis.
    Grid (grid_f, grid_n); N axis last ('arbitrary').  Output (2, tf)."""
    ni = pl.program_id(1)

    @pl.when(ni == 0)
    def _():
        sum_ref[...] = jnp.zeros_like(sum_ref)
        sq_ref[...] = jnp.zeros_like(sq_ref)

    x = x_ref[...].astype(jnp.float32)                  # (tile_n, tf)
    if mask_rows:
        # Zero out-of-range rows of the boundary N tile (select, so stale VMEM
        # garbage / NaNs never reach the sums).
        rows_left = n_total - ni * tile_n
        row_idx = jax.lax.broadcasted_iota(jnp.int32, x.shape, 0)
        x = jnp.where(row_idx < rows_left, x, 0.0)

    sum_ref[...] += jnp.sum(x, axis=0, keepdims=True)
    sq_ref[...] += jnp.sum(x * x, axis=0, keepdims=True)

    @pl.when(ni == pl.num_programs(1) - 1)
    def _():
        inv_n = 1.0 / n_total
        mean = sum_ref[...] * inv_n
        var = jnp.maximum(sq_ref[...] * inv_n - mean * mean, 0.0)
        stats_ref[...] = jnp.concatenate([mean, jnp.sqrt(var)], axis=0)


def _bn_apply_kernel(x_ref, coef_ref, o_ref):
    """Pass 2: out = (x - mean) * scale + shift, per lane-dense tile."""
    x = x_ref[...].astype(jnp.float32)                  # (tile_n, tf)
    c = coef_ref[...]                                   # (3, tf): mean, scale, shift
    mean = c[0:1, :]
    scale = c[1:2, :]
    shift = c[2:3, :]
    o_ref[...] = ((x - mean) * scale + shift).astype(o_ref.dtype)


# --------------------------------------------------------------------------
# Wrapper
# --------------------------------------------------------------------------
def new_batchnorm1d_forward(x, weight, bias, running_mean, running_var, *,
                            eps=1e-5, momentum=0.1, tile_f=1024, tile_n=None,
                            force_two_pass=False):
    """Pallas implementation of NewBatchNorm1D.forward (training mode, SD).

    Returns (bn_output, new_running_mean, new_running_var)."""
    N, F = x.shape
    out_dtype = x.dtype
    x_item = jnp.dtype(x.dtype).itemsize
    out_item = jnp.dtype(out_dtype).itemsize

    vmem_limit, budget = _vmem_budget()

    def _row(v):
        return v.reshape(1, F).astype(jnp.float32)

    # Feasibility of the single-pass (whole batch per feature tile) path:
    # double-buffered x + out blocks plus the in-kernel f32 working copies
    # (x32, xc) per feature column.
    per_col = N * (2 * x_item + 2 * out_item + 2 * 4)
    max_cols = (budget // max(per_col, 1)) // _LANE * _LANE

    if not force_two_pass and max_cols >= _LANE:
        # ---------------- single pass ----------------
        tf = min(tile_f, max_cols)
        if tf >= F:
            tf = F                                      # one full-width block
        else:
            tf = max(_LANE, (tf // _LANE) * _LANE)      # lane-dense tile
        grid_f = pl.cdiv(F, tf)

        params = jnp.concatenate(
            [_row(weight), _row(bias), _row(running_mean), _row(running_var)],
            axis=0)                                     # (4, F) float32

        out, stats = pl.pallas_call(
            partial(_bn_single_pass_kernel, eps=eps, momentum=momentum),
            out_shape=(
                jax.ShapeDtypeStruct((N, F), out_dtype),
                jax.ShapeDtypeStruct((2, F), jnp.float32),
            ),
            grid=(grid_f,),
            in_specs=[
                pl.BlockSpec((N, tf), lambda j: (0, j)),   # x: whole batch, one tile
                pl.BlockSpec((4, tf), lambda j: (0, j)),   # packed params
            ],
            out_specs=(
                pl.BlockSpec((N, tf), lambda j: (0, j)),   # bn output
                pl.BlockSpec((2, tf), lambda j: (0, j)),   # packed running stats
            ),
            compiler_params=pltpu.CompilerParams(
                dimension_semantics=("parallel",),
                vmem_limit_bytes=vmem_limit,
            ),
        )(x, params)

        new_rm = stats[0].astype(running_mean.dtype)
        new_rv = stats[1].astype(running_var.dtype)
        return out, new_rm, new_rv

    # ---------------- two-pass (N-tiled) fallback ----------------
    tf = min(tile_f, 1024)
    if tf >= F:
        tf = F
    else:
        tf = max(_LANE, (tf // _LANE) * _LANE)

    per_row = tf * (2 * x_item + 2 * out_item + 2 * 4)
    tn_cap = max(_SUBLANE, (budget // max(per_row, 1)) // _SUBLANE * _SUBLANE)
    tn = tile_n if tile_n is not None else 1024
    tn = min(tn, tn_cap)
    if tn >= N:
        tn = N                                          # single full-height block
    else:
        tn = max(_SUBLANE, (tn // _SUBLANE) * _SUBLANE)

    grid_f = pl.cdiv(F, tf)
    grid_n = pl.cdiv(N, tn)
    mask_rows = (N % tn) != 0

    # Pass 1: per-feature mean / std.
    stats = pl.pallas_call(
        partial(_bn_stats_kernel, n_total=N, tile_n=tn, mask_rows=mask_rows),
        out_shape=jax.ShapeDtypeStruct((2, F), jnp.float32),
        grid=(grid_f, grid_n),
        in_specs=[pl.BlockSpec((tn, tf), lambda j, n: (n, j))],
        out_specs=pl.BlockSpec((2, tf), lambda j, n: (0, j)),
        scratch_shapes=[
            pltpu.VMEM((1, tf), jnp.float32),   # sum
            pltpu.VMEM((1, tf), jnp.float32),   # sum of squares
        ],
        compiler_params=pltpu.CompilerParams(
            dimension_semantics=("parallel", "arbitrary"),
            vmem_limit_bytes=vmem_limit,
        ),
    )(x)

    mean = stats[0]
    dev = stats[1]
    w32 = weight.astype(jnp.float32)
    b32 = bias.astype(jnp.float32)
    scale = w32 / (dev + eps)
    coef = jnp.concatenate(
        [mean.reshape(1, F), scale.reshape(1, F), b32.reshape(1, F)], axis=0)

    # Pass 2: normalize.
    out = pl.pallas_call(
        _bn_apply_kernel,
        out_shape=jax.ShapeDtypeStruct((N, F), out_dtype),
        grid=(grid_f, grid_n),
        in_specs=[
            pl.BlockSpec((tn, tf), lambda j, n: (n, j)),
            pl.BlockSpec((3, tf), lambda j, n: (0, j)),
        ],
        out_specs=pl.BlockSpec((tn, tf), lambda j, n: (n, j)),
        compiler_params=pltpu.CompilerParams(
            dimension_semantics=("parallel", "parallel"),
            vmem_limit_bytes=vmem_limit,
        ),
    )(x, coef)

    new_rm = (momentum * mean
              + (1.0 - momentum) * running_mean.astype(jnp.float32)
              ).astype(running_mean.dtype)
    new_rv = (momentum * dev
              + (1.0 - momentum) * running_var.astype(jnp.float32)
              ).astype(running_var.dtype)
    return out, new_rm, new_rv


# --------------------------------------------------------------------------
# Pure-JAX reference (mirrors the PyTorch module, training + 'SD')
# --------------------------------------------------------------------------
def _reference_forward(x, weight, bias, running_mean, running_var, eps, momentum):
    x32 = x.astype(jnp.float32)
    mean = jnp.mean(x32, axis=0)
    dev = jnp.std(x32, axis=0)            # biased (ddof=0) == unbiased=False
    out = weight * (x32 - mean) / (dev + eps) + bias
    new_rm = momentum * mean + (1.0 - momentum) * running_mean
    new_rv = momentum * dev + (1.0 - momentum) * running_var
    return out.astype(x.dtype), new_rm, new_rv


if __name__ == "__main__":
    key = jax.random.PRNGKey(0)
    k1, k2, k3, k4 = jax.random.split(key, 4)

    # ---------- Test 1: single-pass path (batch=8, hidden=32) ----------
    N, F = 8, 32
    x = jax.random.normal(k1, (N, F), dtype=jnp.float32)
    # reset_parameters(): weight ~ U[0,1), bias = 0, running_mean = 0, running_var = 1
    weight = jax.random.uniform(k2, (F,), dtype=jnp.float32)
    bias = jnp.zeros((F,), dtype=jnp.float32)
    running_mean = jnp.zeros((F,), dtype=jnp.float32)
    running_var = jnp.ones((F,), dtype=jnp.float32)

    out, nrm, nrv = new_batchnorm1d_forward(
        x, weight, bias, running_mean, running_var, eps=1e-5, momentum=0.1)
    out = jax.block_until_ready(out)
    nrm = jax.block_until_ready(nrm)
    nrv = jax.block_until_ready(nrv)

    ref_out, ref_rm, ref_rv = _reference_forward(
        x, weight, bias, running_mean, running_var, 1e-5, 0.1)
    assert jnp.allclose(out, ref_out, atol=1e-4, rtol=1e-4), "output mismatch"
    assert jnp.allclose(nrm, ref_rm, atol=1e-4, rtol=1e-4), "running_mean mismatch"
    assert jnp.allclose(nrv, ref_rv, atol=1e-4, rtol=1e-4), "running_var mismatch"

    # ---------- Test 2: two-pass (N-tiled) fallback with masked boundary tiles ----------
    N2, F2 = 13, 200          # non-multiple of 8 rows, non-multiple of 128 cols
    x2 = jax.random.normal(k3, (N2, F2), dtype=jnp.float32)
    w2 = jax.random.uniform(k4, (F2,), dtype=jnp.float32)
    b2 = jnp.zeros((F2,), dtype=jnp.float32)
    rm2 = jnp.zeros((F2,), dtype=jnp.float32)
    rv2 = jnp.ones((F2,), dtype=jnp.float32)

    out2, nrm2, nrv2 = new_batchnorm1d_forward(
        x2, w2, b2, rm2, rv2, eps=1e-5, momentum=0.1,
        force_two_pass=True, tile_n=8)
    out2 = jax.block_until_ready(out2)
    nrm2 = jax.block_until_ready(nrm2)
    nrv2 = jax.block_until_ready(nrv2)

    ref_out2, ref_rm2, ref_rv2 = _reference_forward(
        x2, w2, b2, rm2, rv2, 1e-5, 0.1)
    assert jnp.allclose(out2, ref_out2, atol=1e-4, rtol=1e-4), "2-pass output mismatch"
    assert jnp.allclose(nrm2, ref_rm2, atol=1e-4, rtol=1e-4), "2-pass running_mean mismatch"
    assert jnp.allclose(nrv2, ref_rv2, atol=1e-4, rtol=1e-4), "2-pass running_var mismatch"

    print("KERNEL_OK")
</pallas_src>

<mosaic_0001>
module attributes {stable_mosaic.version = 11 : i64} {
  func.func @_bn_single_pass_kernel(%arg0: i32, %arg1: memref<8x32xf32, #tpu.memory_space<vmem>>, %arg2: memref<4x32xf32, #tpu.memory_space<vmem>>, %arg3: memref<8x32xf32, #tpu.memory_space<vmem>>, %arg4: memref<2x32xf32, #tpu.memory_space<vmem>>) attributes {dimension_semantics = [#tpu.dimension_semantics<parallel>], iteration_bounds = array<i64: 1>, scalar_prefetch = 0 : i64, scratch_operands = 0 : i64, tpu.core_type = #tpu.core_type<tc>, window_params = [{transform_indices = @transform_0, window_bounds = array<i64: 8, 32>}, {transform_indices = @transform_1, window_bounds = array<i64: 4, 32>}, {transform_indices = @transform_2, window_bounds = array<i64: 8, 32>}, {transform_indices = @transform_3, window_bounds = array<i64: 2, 32>}]} {
    %c0 = arith.constant 0 : index
    %c0_0 = arith.constant 0 : index
    %0 = vector.load %arg1[%c0, %c0_0] : memref<8x32xf32, #tpu.memory_space<vmem>>, vector<8x32xf32>
    %cst = arith.constant dense<0.000000e+00> : vector<32xf32>
    %1 = vector.multi_reduction <add>, %0, %cst [0] : vector<8x32xf32> to vector<32xf32>
    %2 = vector.shape_cast %1 : vector<32xf32> to vector<1x32xf32>
    %cst_1 = arith.constant 8.000000e+00 : f32
    %3 = vector.broadcast %cst_1 : f32 to vector<1x32xf32>
    %4 = arith.divf %2, %3 : vector<1x32xf32>
    %5 = vector.broadcast %4 : vector<1x32xf32> to vector<8x32xf32>
    %6 = arith.subf %0, %5 : vector<8x32xf32>
    %7 = arith.mulf %6, %6 : vector<8x32xf32>
    %cst_2 = arith.constant dense<0.000000e+00> : vector<32xf32>
    %8 = vector.multi_reduction <add>, %7, %cst_2 [0] : vector<8x32xf32> to vector<32xf32>
    %9 = vector.shape_cast %8 : vector<32xf32> to vector<1x32xf32>
    %cst_3 = arith.constant 8.000000e+00 : f32
    %10 = vector.broadcast %cst_3 : f32 to vector<1x32xf32>
    %11 = arith.divf %9, %10 : vector<1x32xf32>
    %12 = math.sqrt %11 : vector<1x32xf32>
    %c0_4 = arith.constant 0 : index
    %c0_5 = arith.constant 0 : index
    %13 = vector.load %arg2[%c0_4, %c0_5] : memref<4x32xf32, #tpu.memory_space<vmem>>, vector<4x32xf32>
    %14 = vector.extract_strided_slice %13 {offsets = [0, 0], sizes = [1, 32], strides = [1, 1]} : vector<4x32xf32> to vector<1x32xf32>
    %15 = vector.extract_strided_slice %13 {offsets = [1, 0], sizes = [1, 32], strides = [1, 1]} : vector<4x32xf32> to vector<1x32xf32>
    %16 = vector.extract_strided_slice %13 {offsets = [2, 0], sizes = [2, 32], strides = [1, 1]} : vector<4x32xf32> to vector<2x32xf32>
    %cst_6 = arith.constant 9.99999974E-6 : f32
    %17 = vector.broadcast %cst_6 : f32 to vector<1x32xf32>
    %18 = arith.addf %12, %17 : vector<1x32xf32>
    %19 = arith.divf %14, %18 : vector<1x32xf32>
    %20 = vector.broadcast %19 : vector<1x32xf32> to vector<8x32xf32>
    %21 = arith.mulf %6, %20 : vector<8x32xf32>
    %22 = vector.broadcast %15 : vector<1x32xf32> to vector<8x32xf32>
    %23 = arith.addf %21, %22 : vector<8x32xf32>
    %c0_7 = arith.constant 0 : index
    %c0_8 = arith.constant 0 : index
    %24 = vector.load %arg3[%c0_7, %c0_8] : memref<8x32xf32, #tpu.memory_space<vmem>>, vector<8x32xf32>
    tpu.vector_store %arg3[%c0_7, %c0_8], %23 {strides = array<i32>} : memref<8x32xf32, #tpu.memory_space<vmem>>, vector<8x32xf32>,
    %25 = tpu.concatenate %4, %12 in 0 : vector<1x32xf32>, vector<1x32xf32> -> vector<2x32xf32>
    %cst_9 = arith.constant 1.000000e-01 : f32
    %26 = vector.broadcast %cst_9 : f32 to vector<2x32xf32>
    %27 = arith.mulf %26, %25 : vector<2x32xf32>
    %cst_10 = arith.constant 0.899999976 : f32
    %28 = vector.broadcast %cst_10 : f32 to vector<2x32xf32>
    %29 = arith.mulf %28, %16 : vector<2x32xf32>
    %30 = arith.addf %27, %29 : vector<2x32xf32>
    %c0_11 = arith.constant 0 : index
    %c0_12 = arith.constant 0 : index
    %31 = vector.load %arg4[%c0_11, %c0_12] : memref<2x32xf32, #tpu.memory_space<vmem>>, vector<2x32xf32>
    tpu.vector_store %arg4[%c0_11, %c0_12], %30 {strides = array<i32>} : memref<2x32xf32, #tpu.memory_space<vmem>>, vector<2x32xf32>,
    return
  }
  func.func @transform_0(%arg0: i32) -> (i32, i32) {
    %c0_i32 = arith.constant 0 : i32
    %c0_i32_0 = arith.constant 0 : i32
    return %c0_i32, %arg0 : i32, i32
  }
  func.func @transform_1(%arg0: i32) -> (i32, i32) {
    %c0_i32 = arith.constant 0 : i32
    %c0_i32_0 = arith.constant 0 : i32
    return %c0_i32, %arg0 : i32, i32
  }
  func.func @transform_2(%arg0: i32) -> (i32, i32) {
    %c0_i32 = arith.constant 0 : i32
    %c0_i32_0 = arith.constant 0 : i32
    return %c0_i32, %arg0 : i32, i32
  }
  func.func @transform_3(%arg0: i32) -> (i32, i32) {
    %c0_i32 = arith.constant 0 : i32
    %c0_i32_0 = arith.constant 0 : i32
    return %c0_i32, %arg0 : i32, i32
  }
}

</mosaic_0001>

<bundles_post_ra>
// kernel: tpu_custom_call.1
= control target key start
LH: loop header
LB: loop body
LE: loop exit
PB: predicated region body
PF: predicated region fallthrough
CT: control target
= control target key end

     0   :  { %9 = vsyncpa [#allocation3], 0  ;;  %s301_s0 = inlined_call_operand.hbm [shape: f32[8,32], index: 0, kind: input, shape index: {}]   ;;  %s302_s1 = inlined_call_operand.hbm [shape: f32[4,32], index: 1, kind: input, shape index: {}]   ;;  %s303_s2 = inlined_call_operand.hbm [shape: f32[8,32], index: 2, kind: output, shape index: {0}]   ;;  %s304_s3 = inlined_call_operand.hbm [shape: f32[2,32], index: 3, kind: output, shape index: {1}]  }
   0x1   :  { %10 = vsyncpa [#allocation6], 0 }
   0x2   :  { %11 = vsyncpa [#allocation4], 0 }
   0x3   :  { %12 = vsyncpa [#allocation9], 0  ;;  %s226_s12 = smov [#allocation2]   ;;  %s227_s14 = smov [#allocation5]  }
   0x4   :  { %s19_s13 = sshll.u32 %s226_s12, 4  ;;  %s29_s15 = sshll.u32 %s227_s14, 4  ;;  %s20_s13 = int_to_ptr.vmem [resolvable:$true] %s19_s13  ;;  %s30_s15 = int_to_ptr.vmem [resolvable:$true] %s29_s15 }
   0x5   :  { %s130_s18 = scalar_lea.hbm %s301_s0, 128 }
   0x6   :  { %p131_p0 = scmp.ne.s32.totalorder %s301_s0, %s130_s18  ;;  %p134_p1 = scmp.lt.u32.totalorder %s130_s18, %s301_s0 }
   0x8   :  { %p136_p2 = pnand %p134_p1, %p131_p0 }
   0xa   :  { %139 = shalt.err (!%p136_p2)
}
   0xb   :  { %s140_s23 = scalar_lea.vmem %s20_s13, 128  ;;  %p145_p4 = scmp.lt.s32.totalorder %s20_s13, %s20_s13 }
   0xc   :  { %p141_p3 = scmp.ne.s32.totalorder %s20_s13, %s140_s23  ;;  %p146_p5 = scmp.lt.s32.totalorder %s140_s23, %s140_s23 }
   0xe   :  { %p147_p6 = por %p146_p5, %p145_p4 }
  0x10   :  { %p148_p7 = pnand %p147_p6, %p141_p3 }
  0x12   :  { %151 = shalt.err (!%p148_p7)
}
  0x13   :  { %22 = dma.hbm_to_vmem [thread:$0]  %s301_s0, 128, %s20_s13, [#allocation3]  }
  0x14   :  { %s152_s28 = scalar_lea.hbm %s302_s1, 64 }
  0x15   :  { %p153_p8 = scmp.ne.s32.totalorder %s302_s1, %s152_s28  ;;  %p156_p9 = scmp.lt.u32.totalorder %s152_s28, %s302_s1 }
  0x17   :  { %p158_p10 = pnand %p156_p9, %p153_p8 }
  0x19   :  { %161 = shalt.err (!%p158_p10)
}
  0x1a   :  { %s162_s6 = scalar_lea.vmem %s30_s15, 64  ;;  %p167_p12 = scmp.lt.s32.totalorder %s30_s15, %s30_s15 }
  0x1b   :  { %p163_p11 = scmp.ne.s32.totalorder %s30_s15, %s162_s6  ;;  %p168_p13 = scmp.lt.s32.totalorder %s162_s6, %s162_s6 }
  0x1d   :  { %p169_p0 = por %p168_p13, %p167_p12 }
  0x1f   :  { %p170_p1 = pnand %p169_p0, %p163_p11 }
  0x21   :  { %173 = shalt.err (!%p170_p1)
}
  0x22   :  { %32 = dma.hbm_to_vmem [thread:$0]  %s302_s1, 64, %s30_s15, [#allocation6]  }
  0x23   :  { %218 = dma.done.wait [#allocation3], 128  }
  0x24   :  { %219 = vsyncadd [#allocation3], 4294967168 }
  0x25   :  { %220 = dma.done.wait [#allocation6], 64  }
  0x26   :  { %221 = vsyncadd [#allocation6], 4294967232  ;;  %vm40_vm0 = vcmask 261120   ;;  %v39_v0 = vld [vmem:[#allocation2] sm:$0xff]  ;;  %v67_v19 = vld [vmem:[#allocation5] sm:$0xf]  ;;  %v71_v30 = vlaneseq }
  0x27   :  { %v41_v1 = vsel %vm40_vm0, %v39_v0, 0.0  ;;  %v85_v22 = vmul.f32 0.9, %v67_v19  ;;  %vm82_vm3 = vcmask 1040384   ;;  %s228_s1 = smov [#allocation8]   ;;  %vm90_vm4 = vcmask 254976  }
  0x28   :  { %v42_v2 = vrot.slane %v41_v1, 4  ;;  %s108_s8 = sshll.u32 %s228_s1, 4  ;;  %s109_s8 = int_to_ptr.vmem [resolvable:$true] %s108_s8 }
  0x29   :  { %v87_v26 = vrot.slane %v85_v22, 2  ;;  %s174_s9 = scalar_lea.vmem %s109_s8, 32  ;;  %p179_p3 = scmp.lt.s32.totalorder %s109_s8, %s109_s8 }
  0x2a   :  { %v43_v3 = vadd.f32 %v42_v2, %v41_v1  ;;  %p175_p2 = scmp.ne.s32.totalorder %s109_s8, %s174_s9  ;;  %p180_p4 = scmp.lt.s32.totalorder %s174_s9, %s174_s9 }
  0x2c   :  { %v44_v4 = vrot.slane %v43_v3, 2  ;;  %p181_p5 = por %p180_p4, %p179_p3 }
  0x2e   :  { %v45_v5 = vadd.f32 %v44_v4, %v43_v3  ;;  %p182_p6 = pnand %p181_p5, %p175_p2 }
  0x30   :  { %v46_v6 = vrot.slane %v45_v5, 1 }
  0x32   :  { %v47_v7 = vadd.f32 %v46_v6, %v45_v5 }
  0x34   :  { %v49_v8 = vmul.f32 0.125, %v47_v7 }
  0x36   :  { %v50_v9 = vsub.f32 %v39_v0, %v49_v8 }
  0x38   :  { %v51_v10 = vmul.f32 %v50_v9, %v50_v9 }
  0x3a   :  { %v52_v11 = vsel %vm40_vm0, %v51_v10, 0.0 }
  0x3b   :  { %v53_v12 = vrot.slane %v52_v11, 4 }
  0x3d   :  { %v54_v13 = vadd.f32 %v53_v12, %v52_v11 }
  0x3f   :  { %v55_v14 = vrot.slane %v54_v13, 2 }
  0x41   :  { %v56_v15 = vadd.f32 %v55_v14, %v54_v13 }
  0x43   :  { %v57_v16 = vrot.slane %v56_v15, 1 }
  0x45   :  { %v58_v17 = vadd.f32 %v57_v16, %v56_v15 }
  0x47   :  { %v59_v18 = vmul.f32 0.125, %v58_v17 }
  0x49   :  { %126 = vrsqrt.f32 %v59_v18  ;;  %vm62_vm1 = vcmp.eq.f32.partialorder %v59_v18, inf  ;;  %v65_v21 = vand.u32 2147483648, %v59_v18  ;;  %vm64_vm2 = vcmp.eq.f32.partialorder %v59_v18, 0.0 }
  0x53   :  { %v127_v20 = vpop.eup %126 }
  0x54   :  { %v61_v23 = vmul.f32 %v127_v20, %v59_v18 }
  0x56   :  { %v63_v24 = vsel %vm62_vm1, %v59_v18, %v61_v23 }
  0x57   :  { %v66_v25 = vsel %vm64_vm2, %v65_v21, %v63_v24 }
  0x58   :  { %v68_v27 = vadd.f32 1e-05, %v66_v25  ;;  %v83_v28 = vsel %vm82_vm3, %v49_v8, %v66_v25 }
  0x59   :  { %v84_v29 = vmul.f32 0.1, %v83_v28 }
  0x5a   :  { %128 = vrcp.f32 %v68_v27 }
  0x5b   :  { %v89_v31 = vadd.f32 %v87_v26, %v84_v29 }
  0x5d   :  { %91 = vst.msk [vmem:[#allocation8] sm:$0x3] %vm90_vm4, %v89_v31 }
  0x5e   :  { %185 = shalt.err (!%p182_p6)
}
  0x5f   :  { %s186_s12 = scalar_lea.hbm %s304_s3, 32 }
  0x60   :  { %p187_p7 = scmp.ne.s32.totalorder %s304_s3, %s186_s12  ;;  %p190_p8 = scmp.lt.u32.totalorder %s186_s12, %s304_s3 }
  0x62   :  { %p192_p9 = pnand %p190_p8, %p187_p7 }
  0x64   :  { %195 = shalt.err (!%p192_p9)
}
  0x65   :  { %111 = dma.vmem_to_hbm [thread:$0]  %s109_s8, 32, %s304_s3, [#allocation9]   ;;  %v72_v32 = vshrl.u32 %v71_v30, 7  ;;  %v129_v35 = vpop.eup %128 }
  0x66   :  { %v70_v36 = vmul.f32 %v129_v35, %v67_v19  ;;  %s229_s19 = smov [#allocation7]  }
  0x67   :  { %v73_v33 = vsub.s32 0, %v72_v32  ;;  %v78_v34 = vsub.s32 1, %v72_v32  ;;  %s98_s20 = sshll.u32 %s229_s19, 4  ;;  %s99_s20 = int_to_ptr.vmem [resolvable:$true] %s98_s20 }
  0x68   :  { %s196_s21 = scalar_lea.vmem %s99_s20, 128  ;;  %p201_p11 = scmp.lt.s32.totalorder %s99_s20, %s99_s20 }
  0x69   :  { %v74_v37 = vrot.slane %v70_v36, %v73_v33  ;;  %v79_v38 = vrot.slane %v67_v19, %v78_v34  ;;  %p197_p10 = scmp.ne.s32.totalorder %s99_s20, %s196_s21  ;;  %p202_p12 = scmp.lt.s32.totalorder %s196_s21, %s196_s21 }
  0x6b   :  { %v75_v39 = vmul.f32 %v74_v37, %v50_v9  ;;  %p203_p13 = por %p202_p12, %p201_p11 }
  0x6d   :  { %v80_v40 = vadd.f32 %v79_v38, %v75_v39  ;;  %p204_p0 = pnand %p203_p13, %p197_p10 }
  0x6f   :  { %81 = vst.msk [vmem:[#allocation7] sm:$0xff] %vm40_vm0, %v80_v40 }
  0x70   :  { %207 = shalt.err (!%p204_p0)
}
  0x71   :  { %s208_s23 = scalar_lea.hbm %s303_s2, 128 }
  0x72   :  { %p209_p1 = scmp.ne.s32.totalorder %s303_s2, %s208_s23  ;;  %p212_p2 = scmp.lt.u32.totalorder %s208_s23, %s303_s2 }
  0x74   :  { %p214_p3 = pnand %p212_p2, %p209_p1 }
  0x76   :  { %217 = shalt.err (!%p214_p3)
}
  0x77   :  { %101 = dma.vmem_to_hbm [thread:$0]  %s99_s20, 128, %s303_s2, [#allocation4]  }
  0x78   :  { %222 = dma.done.wait [#allocation4], 128  }
  0x79   :  { %223 = vsyncadd [#allocation4], 4294967168 }
  0x7a   :  { %224 = dma.done.wait [#allocation9], 32  }
  0x7b   :  { %225 = vsyncadd [#allocation9], 4294967264 }
  0x7c   :  { %118 = vsyncpa [#allocation3], 1 }
  0x7d   :  { %119 = vsyncpa [#allocation6], 1 }
  0x7e   :  { %120 = vsyncpa [#allocation4], 1 }
  0x7f   :  { %121 = vsyncpa [#allocation9], 1 }

</bundles_post_ra>
